<compile_context>
chip_gen: v7x
topology: tpu7x:2x2x1
jax: 0.10.0
libtpu: 0.0.40
codegen_flags: <defaults>
</compile_context>

<pallas_src>
import jax
import jax.numpy as jnp
from jax.experimental import pallas as pl
from jax.experimental.pallas import tpu as pltpu

_LANE = 128
_VMEM_BLOCK_BUDGET = 2 * 1024 * 1024   # per-block bytes; double-buffered in+out => 8 MiB
_VMEM_LIMIT_BYTES = 16 * 1024 * 1024   # explicit scoped-VMEM limit, safe on v5e/v6e/v7x


def _copy_kernel(x_ref, o_ref):
    # Pure data movement: straight lane-dense tile copy.
    o_ref[...] = x_ref[...]


def _choose_tiles(B, L, itemsize, budget_bytes):
    """Pick (block_rows, lane_chunk) for a lane-dense (B, L) identity copy."""
    sub = max(8, 32 // itemsize)  # packed sublane multiple: 8 f32 / 16 bf16 / 32 int8
    total = B * L * itemsize

    if total <= budget_bytes:
        # Whole array fits in one block.  Still split the lane axis into a few chunks
        # so read/write DMAs of adjacent steps overlap (grid=(1,1) serializes
        # read-then-write) and both v7x TensorCores get work.
        n_lane = max(2, min(4, L // _LANE))
        lane_chunk = max(_LANE, (-(-L // n_lane)) // _LANE * _LANE)
        return B, min(lane_chunk, L)

    if L * itemsize * sub <= budget_bytes:
        # Full lane width fits with at least `sub` rows: tile rows only.
        # Round DOWN to the sublane multiple so we never exceed the budget.
        block_rows = (budget_bytes // (L * itemsize)) // sub * sub
        return max(sub, min(block_rows, B)), L

    # Very wide rows: tile the lane axis too, in multiples of 128.
    block_rows = min(B, sub)
    lane_chunk = (budget_bytes // (block_rows * itemsize)) // _LANE * _LANE
    return block_rows, max(_LANE, min(lane_chunk, L))


def squeeze_dim4(a):
    """Pallas equivalent of torch.squeeze(a, 4) for a of shape (B, 1, 384, N, 1)."""
    B, d1, S, N, d4 = a.shape
    assert d1 == 1 and d4 == 1, "module contract: dims 1 and 4 are singleton"

    # Lane-dense 2-D view: (B, S*N).  S = 384 = 3*128, so L is always lane-aligned.
    L = S * N
    x2d = a.reshape(B, L)  # free metadata reshape (contiguous layout)

    itemsize = jnp.dtype(a.dtype).itemsize
    block_rows, lane_chunk = _choose_tiles(B, L, itemsize, _VMEM_BLOCK_BUDGET)
    grid = (pl.cdiv(B, block_rows), pl.cdiv(L, lane_chunk))

    out2d = pl.pallas_call(
        _copy_kernel,
        out_shape=jax.ShapeDtypeStruct((B, L), a.dtype),
        grid=grid,
        in_specs=[pl.BlockSpec((block_rows, lane_chunk), lambda i, j: (i, j))],
        out_specs=pl.BlockSpec((block_rows, lane_chunk), lambda i, j: (i, j)),
        compiler_params=pltpu.CompilerParams(
            dimension_semantics=("parallel", "parallel"),
            vmem_limit_bytes=_VMEM_LIMIT_BYTES,
        ),
    )(x2d)

    # Free metadata reshape back to the squeezed PyTorch output layout (B, 1, 384, N).
    return out2d.reshape(B, d1, S, N)


if __name__ == "__main__":
    key = jax.random.PRNGKey(0)
    B, N = 2, 8  # dynamic dims of the annotated shape [-1, 1, 384, -1, 1]
    a = jax.random.normal(key, (B, 1, 384, N, 1), dtype=jnp.float32)

    out = squeeze_dim4(a)
    out = jax.block_until_ready(out)

    ref = jnp.squeeze(a, axis=4)
    assert out.shape == (B, 1, 384, N), out.shape
    assert out.dtype == jnp.float32
    assert jnp.array_equal(out, ref)
    print("KERNEL_OK")
</pallas_src>

<mosaic_0001>
module attributes {stable_mosaic.version = 11 : i64} {
  func.func @_copy_kernel(%arg0: i32, %arg1: i32, %arg2: memref<2x768xf32, #tpu.memory_space<vmem>>, %arg3: memref<2x768xf32, #tpu.memory_space<vmem>>) attributes {dimension_semantics = [#tpu.dimension_semantics<parallel>, #tpu.dimension_semantics<parallel>], iteration_bounds = array<i64: 1, 4>, scalar_prefetch = 0 : i64, scratch_operands = 0 : i64, tpu.core_type = #tpu.core_type<tc>, window_params = [{transform_indices = @transform_0, window_bounds = array<i64: 2, 768>}, {transform_indices = @transform_1, window_bounds = array<i64: 2, 768>}]} {
    %c0 = arith.constant 0 : index
    %c0_0 = arith.constant 0 : index
    %0 = vector.load %arg2[%c0, %c0_0] : memref<2x768xf32, #tpu.memory_space<vmem>>, vector<2x768xf32>
    %c0_1 = arith.constant 0 : index
    %c0_2 = arith.constant 0 : index
    %1 = vector.load %arg3[%c0_1, %c0_2] : memref<2x768xf32, #tpu.memory_space<vmem>>, vector<2x768xf32>
    tpu.vector_store %arg3[%c0_1, %c0_2], %0 {strides = array<i32>} : memref<2x768xf32, #tpu.memory_space<vmem>>, vector<2x768xf32>,
    return
  }
  func.func @transform_0(%arg0: i32, %arg1: i32) -> (i32, i32) {
    %c0_i32 = arith.constant 0 : i32
    return %arg0, %arg1 : i32, i32
  }
  func.func @transform_1(%arg0: i32, %arg1: i32) -> (i32, i32) {
    %c0_i32 = arith.constant 0 : i32
    return %arg0, %arg1 : i32, i32
  }
}

</mosaic_0001>

<bundles_post_ra>
// kernel: tpu_custom_call.1
= control target key start
LH: loop header
LB: loop body
LE: loop exit
PB: predicated region body
PF: predicated region fallthrough
CT: control target
= control target key end

     0   :  { %6 = vsyncpa [#allocation3], 0  ;;  %s627_s0 = inlined_call_operand.hbm [shape: f32[2,3072], index: 0, kind: input, shape index: {}]   ;;  %s628_s1 = inlined_call_operand.hbm [shape: f32[2,3072], index: 1, kind: output, shape index: {}]  }
   0x1   :  { %8 = vsyncpa [#allocation3 + $0x1], 0 }
   0x2   :  { %9 = vsyncpa [#allocation4], 0 }
   0x3   :  { %11 = vsyncpa [#allocation4 + $0x1], 0  ;;  %s459_s6 = smov 0   ;;  %s461_s7 = smov 0  }
   0x4   :  { %s463_s8 = smov 0   ;;  %s465_s9 = smov 0  }
   0x5   :  { %s467_s10 = smov 0   ;;  %s469_s11 = smov 0  }
   0x6 LB: > { %s258_s12 = sadd.s32 4294967295, %s445_s11   ;;  %s259_s13 = sadd.s32 4294967294, %s445_s11   ;;  %s445_s11 = sphi %s469_s11, %s17_s11   ;;  %s441_s10 = sphi %s467_s10, %s642_s10   ;;  %s437_s9 = sphi %s465_s9, %s641_s9   ;;  %s433_s8 = sphi %s463_s8, %s640_s8   ;;  %s429_s7 = sphi %s461_s7, %s639_s7   ;;  %s425_s6 = sphi %s459_s6, %s638_s6  }
   0x7   : > { %s26_s14 = sadd.s32 1, %s441_s10  ;;  %s38_s15 = sadd.s32 1, %s433_s8 }
   0x8   : > { %p27_p0 = scmp.ge.s32.totalorder %s26_s14, 4  ;;  %p45_p1 = scmp.ne.s32.totalorder %s433_s8, %s429_s7 }
   0x9   : > { %p46_p2 = scmp.eq.s32.totalorder %s445_s11, 0  ;;  %p51_p3 = scmp.ne.s32.totalorder %s429_s7, %s425_s6 }
   0xa   : > { %s644_s14 = smov (%p27_p0, %s26_s14), 0  ;;  %p52_p5 = scmp.eq.s32.totalorder %s258_s12, 0 }
   0xb   : > { %p500_p4 = por %p46_p2, %p45_p1  ;;  %s34_s17 = ssub.s32 %s441_s10, %s644_s14 }
   0xc   : > { %p77_p6 = scmp.eq.s32.totalorder %s258_s12, 3  ;;  %p36_p7 = scmp.eq.s32.totalorder %s34_s17, 0 }
   0xd   : > { %p506_p8 = por %p52_p5, %p51_p3  ;;  %p83_p10 = scmp.eq.s32.totalorder %s259_s13, 3 }
   0xe   : > { %p510_p9 = por %p77_p6, %p45_p1  ;;  %p283_p12 = scmp.lt.s32.totalorder %s445_s11, 4 }
   0xf   : > { %s515_s20 = scalar_select %p36_p7, %s433_s8, %s38_s15  }
  0x10   : > { %s632_s19 = scalar_select %p510_p9, 1, 0 }
  0x11   : > { %p517_p11 = por %p83_p10, %p51_p3  ;;  %s103_s22 = sand.u32 1, %s433_s8  }
  0x12   : > { %s269_s23 = smul.u32 12, %s103_s22  ;;  %p526_p13 = pnand %p283_p12, %p500_p4 }
  0x13   : > { %s633_s21 = scalar_select %p517_p11, 1, 0 }
  0x14   : > { %s267_s24 = smul.u32 192, %s441_s10  ;;  %s107_s29 = scalar_lea.vmem [#allocation2], %s269_s23 }
  0x15   : > { %s117_s30 = sshll.u32 %s107_s29, 4  ;;  %s104_s2 = scalar_lea.sflag [#allocation3], %s103_s22  ;;  %s536_s30 = int_to_ptr.vmem [resolvable:$true] %s117_s30 }
  0x16   : > { %s534_s28 = scalar_lea.hbm %s627_s0, %s267_s24  ;;  %p335_p2 = pneg %p526_p13 }
  0x17   : > { %s333_s3 = scalar_lea.hbm %s534_s28, 192  ;;  %s338_s12 = scalar_lea.hbm %s627_s0, 768 }
  0x18   : > { %p334_p1 = scmp.ne.s32.totalorder %s534_s28, %s333_s3  ;;  %p339_p5 = scmp.lt.u32.totalorder %s534_s28, %s627_s0 }
  0x19   : > { %p340_p6 = scmp.lt.u32.totalorder %s338_s12, %s333_s3  ;;  %p342_p10 = scmp.lt.u32.totalorder %s333_s3, %s534_s28 }
  0x1a   : > { %p336_p3 = pnand %p335_p2, %p334_p1 }
  0x1b   : > { %p341_p7 = por %p340_p6, %p339_p5 }
  0x1c   : > { %p337_p4 = pneg %p336_p3 }
  0x1d   : > { %p343_p12 = por %p342_p10, %p341_p7 }
  0x1f   : > { %p344_p0 = pnand %p343_p12, %p337_p4 }
  0x21   : > { %347 = shalt.err (!%p344_p0)
}
  0x22   : > { %s348_s16 = scalar_lea.vmem %s536_s30, 192  ;;  %s447_s17 = smov [#allocation2]  }
  0x23   : > { %p349_p1 = scmp.ne.s32.totalorder %s536_s30, %s348_s16  ;;  %s353_s22 = sshll.u32 %s447_s17, 4  ;;  %s354_s22 = int_to_ptr.vmem [resolvable:$false] %s353_s22 }
  0x24   : > { %s355_s23 = scalar_lea.vmem %s354_s22, 384  ;;  %p356_p9 = scmp.lt.s32.totalorder %s536_s30, %s354_s22 }
  0x25   : > { %p351_p3 = pnand %p349_p1, %p335_p2  ;;  %p357_p5 = scmp.lt.s32.totalorder %s355_s23, %s348_s16 }
  0x27   : > { %p352_p11 = pneg %p351_p3  ;;  %p358_p6 = por %p357_p5, %p356_p9 }
  0x29   : > { %p359_p7 = pnand %p358_p6, %p352_p11 }
  0x2b   : > { %362 = shalt.err (!%p359_p7)
}
  0x2c   : > { %278 = dma.hbm_to_vmem [thread:$0]  (!%p526_p13), %s534_s28, 192, %s536_s30, %s104_s2  }
  0x2d   : > { %p122_p0 = scmp.lt.s32.totalorder %s445_s11, 5  ;;  %p635_p4 = scmp.ge.s32.totalorder %s445_s11, 1 }
  0x2f   : > { %p123_p2 = pnand %p635_p4, %p122_p0 }
  0x30   : > { %s567_s24 = sand.u32 (!%p123_p2), 1, %s429_s7  }
  0x31   : > { %126 = sbr.rel (%p123_p2) target bundleno = 83 (0x53), region = 24  ;;  %s129_s27 = scalar_lea.sflag (!%p123_p2), [#allocation3], %s567_s24 }
  0x32   : > { %s270_s26 = smul.u32 (!%p123_p2), 12, %s567_s24 }
  0x34   : > { %s132_s29 = scalar_lea.vmem (!%p123_p2), [#allocation2], %s270_s26 }
  0x38   : > { %416 = dma.done.wait (%p506_p8), %s129_s27, 192  }
  0x39   : > { %418 = vsyncadd (%p506_p8), %s129_s27, 4294967104  ;;  %s268_s25 = smul.u32 192, %s437_s9  ;;  %s150_s28 = scalar_lea.vmem [#allocation5], %s270_s26  ;;  %v153_v0 = vld [vmem:[%s132_s29] sm:$0xff]  ;;  %v154_v1 = vld [vmem:[%s132_s29 + $0x8] sm:$0xf] }
  0x3a   : > { %s174_s30 = sshll.u32 %s150_s28, 4  ;;  %155 = vst [vmem:[%s150_s28] sm:$0xff] %v153_v0  ;;  %156 = vst [vmem:[%s150_s28 + $0x8] sm:$0xf] %v154_v1  ;;  %s158_s18 = scalar_lea.sflag [#allocation4], %s567_s24  ;;  %s576_s30 = int_to_ptr.vmem [resolvable:$true] %s174_s30 }
  0x3b   : > { %s581_s4 = scalar_lea.hbm %s628_s1, %s268_s25  ;;  %s363_s5 = scalar_lea.vmem %s576_s30, 192 }
  0x3c   : > { %p364_p8 = scmp.ne.s32.totalorder %s576_s30, %s363_s5  ;;  %p636_p9 = scmp.ne.s32.totalorder %s632_s19, 0 }
  0x3d   : > { %s448_s9 = smov [#allocation5]  }
  0x3e   : > { %p365_p11 = pnand %p364_p8, %p636_p9  ;;  %s367_s12 = sshll.u32 %s448_s9, 4  ;;  %s368_s12 = int_to_ptr.vmem [resolvable:$false] %s367_s12 }
  0x3f   : > { %s369_s13 = scalar_lea.vmem %s368_s12, 384  ;;  %p370_p10 = scmp.lt.s32.totalorder %s576_s30, %s368_s12 }
  0x40   : > { %p366_p13 = pneg %p365_p11  ;;  %p371_p12 = scmp.lt.s32.totalorder %s369_s13, %s363_s5 }
  0x42   : > { %p372_p1 = por %p371_p12, %p370_p10 }
  0x44   : > { %p373_p3 = pnand %p372_p1, %p366_p13 }
  0x46   : > { %376 = shalt.err (!%p373_p3)
}
  0x47   : > { %s377_s15 = scalar_lea.hbm %s581_s4, 192  ;;  %s381_s22 = scalar_lea.hbm %s628_s1, 768 }
  0x48   : > { %p378_p5 = scmp.ne.s32.totalorder %s581_s4, %s377_s15  ;;  %p382_p0 = scmp.lt.u32.totalorder %s581_s4, %s628_s1 }
  0x49   : > { %p383_p4 = scmp.lt.u32.totalorder %s381_s22, %s377_s15  ;;  %p385_p8 = scmp.lt.u32.totalorder %s377_s15, %s581_s4 }
  0x4a   : > { %p379_p6 = pnand %p378_p5, %p636_p9 }
  0x4b   : > { %p384_p2 = por %p383_p4, %p382_p0 }
  0x4c   : > { %p380_p7 = pneg %p379_p6 }
  0x4d   : > { %p386_p11 = por %p385_p8, %p384_p2 }
  0x4f   : > { %p387_p13 = pnand %p386_p11, %p380_p7 }
  0x51   : > { %390 = shalt.err (!%p387_p13)
}
  0x52   : > { %273 = dma.vmem_to_hbm [thread:$0]  (%p636_p9), %s576_s30, 192, %s581_s4, %s158_s18  }
  0x53 PF: > { %p284_p10 = scmp.ge.s32.totalorder %s445_s11, 2  ;;  %s186_s26 = sand.u32 1, %s425_s6  }
  0x54   : > { %p637_p12 = scmp.ne.s32.totalorder %s633_s21, 0  ;;  %s187_s27 = scalar_lea.sflag [#allocation4], %s186_s26 }
  0x56   : > { %p280_p1 = pnand %p284_p10, %p637_p12 }
  0x58   : > { %420 = dma.done.wait (!%p280_p1), %s187_s27, 192  }
  0x59   : > { %422 = vsyncadd (!%p280_p1), %s187_s27, 4294967104  ;;  %s17_s11 = sadd.s32 1, %s445_s11   ;;  %s638_s6 = smov %s429_s7 }
  0x5a   : > { %p14_p3 = scmp.ge.s32.totalorder %s17_s11, 6   ;;  %s639_s7 = smov %s433_s8 }
  0x5b   : > { %s640_s8 = smov %s515_s20  ;;  %s641_s9 = smov %s441_s10 }
  0x5c   : > { %s642_s10 = smov %s644_s14  ;;  %16 = sbr.rel (!%p14_p3) target bundleno = 6 (0x6), region = 69 }
  0x63   :  { %192 = vsyncpa [#allocation3], 1 }
  0x64   :  { %194 = vsyncpa [#allocation3 + $0x1], 1 }
  0x65   :  { %195 = vsyncpa [#allocation4], 1 }
  0x66   :  { %197 = vsyncpa [#allocation4 + $0x1], 1 }

</bundles_post_ra>
